<compile_context>
chip_gen: v7x
topology: tpu7x:2x2x1
jax: 0.10.0
libtpu: 0.0.40
codegen_flags: <defaults>
</compile_context>

<pallas_src>
import functools

import jax
import jax.numpy as jnp
from jax.experimental import pallas as pl
from jax.experimental.pallas import tpu as pltpu


def _norm_kernel(img_ref, scale_ref, bias_ref, out_ref, *, tr):
    # img_ref:   (tr, thw)      lane-dense tile of the flattened image
    # scale_ref: (rows_pad, 1)  f32, fully resident:  1 / std[channel(row)]
    # bias_ref:  (rows_pad, 1)  f32, fully resident: -mean[ch] / std[ch]
    i = pl.program_id(0)
    r0 = pl.multiple_of(i * tr, tr)
    s = scale_ref[pl.ds(r0, tr), :]            # (tr, 1)
    b = bias_ref[pl.ds(r0, tr), :]             # (tr, 1)
    x = img_ref[...].astype(jnp.float32)       # compute in f32 on the VPU
    out_ref[...] = (x * s + b).astype(out_ref.dtype)


def _round_up(x, m):
    return ((x + m - 1) // m) * m


def _sublane_step(dtype):
    """Native packed sublane count: 8 for 32-bit, 16 for 16-bit, 32 for 8-bit."""
    it = jnp.dtype(dtype).itemsize
    if it >= 4:
        return 8
    if it == 2:
        return 16
    return 32


def _budgets():
    """(pipelined-VMEM byte budget, vmem_limit_bytes) for this TPU generation."""
    try:
        cap = pltpu.get_tpu_info().vmem_capacity_bytes
    except Exception:
        cap = 64 << 20  # conservative fallback (v7x-sized)
    if cap >= (128 << 20):        # v5e / v6e: 128 MiB physical VMEM
        return 32 << 20, 64 << 20
    return 20 << 20, 32 << 20     # v7x: 64 MiB physical per TensorCore


def _pick_tiles(rows, hw, in_itemsize, out_itemsize, step, pipeline_budget):
    """Fixed tiles: tr multiple of `step`, thw multiple of 128, cdiv grid."""
    # Per-block element budget so that 2*(in_block + out_block) fits the
    # pipelined-VMEM budget (input + output, double-buffered).
    elems = max(step * 128, pipeline_budget // (2 * (in_itemsize + out_itemsize)))
    lane_cap = max(128, (elems // step) // 128 * 128)
    thw = min(_round_up(hw, 128), lane_cap)
    tr_cap = max(step, (elems // thw) // step * step)
    tr = min(_round_up(rows, step), tr_cap)

    # Megacore balance (v7x): make sure there are >= 2 grid steps when possible
    # so both TensorCores get work; harmless on single-TC v5e/v6e.
    for _ in range(16):
        if pl.cdiv(rows, tr) * pl.cdiv(hw, thw) >= 2:
            break
        if thw > 128:
            thw = max(128, _round_up(thw // 2, 128))
        elif tr > step:
            tr = max(step, _round_up(tr // 2, step))
        else:
            break
    return tr, thw


def normalization_forward(img, mean, std):
    """(img - mean.reshape(-1,1,1)) / std.reshape(-1,1,1) for NCHW img."""
    B, C, H, W = img.shape
    rows, hw = B * C, H * W

    # PyTorch-style promotion: integer / low-precision images normalize to f32.
    out_dtype = jnp.promote_types(img.dtype, jnp.float32)

    # Fold (x - mean) / std -> x * scale + bias; keep scale/bias in f32.
    mean_f32 = mean.reshape(-1).astype(jnp.float32)
    std_f32 = std.reshape(-1).astype(jnp.float32)
    scale = 1.0 / std_f32                           # (C,)
    bias = -mean_f32 * scale                        # (C,)
    scale_rows = jnp.tile(scale, B).reshape(rows, 1)  # (B*C, 1) f32
    bias_rows = jnp.tile(bias, B).reshape(rows, 1)    # (B*C, 1) f32

    x2 = img.reshape(rows, hw)                      # lane-dense: last dim = H*W

    step = _sublane_step(img.dtype)
    pipeline_budget, vmem_limit = _budgets()
    in_it = jnp.dtype(img.dtype).itemsize
    out_it = jnp.dtype(out_dtype).itemsize
    tr, thw = _pick_tiles(rows, hw, in_it, out_it, step, pipeline_budget)
    grid = (pl.cdiv(rows, tr), pl.cdiv(hw, thw))

    # Pad the resident scale/bias columns so the in-kernel pl.ds(i*tr, tr)
    # slice is always in bounds, even for the masked trailing row block.
    rows_pad = grid[0] * tr
    if rows_pad != rows:
        pad = ((0, rows_pad - rows), (0, 0))
        scale_rows = jnp.pad(scale_rows, pad)
        bias_rows = jnp.pad(bias_rows, pad)

    out2 = pl.pallas_call(
        functools.partial(_norm_kernel, tr=tr),
        out_shape=jax.ShapeDtypeStruct((rows, hw), out_dtype),
        grid_spec=pltpu.PrefetchScalarGridSpec(
            num_scalar_prefetch=0,
            grid=grid,
            in_specs=[
                pl.BlockSpec((tr, thw), lambda i, j: (i, j)),
                pl.BlockSpec((rows_pad, 1), lambda i, j: (0, 0)),  # resident
                pl.BlockSpec((rows_pad, 1), lambda i, j: (0, 0)),  # resident
            ],
            out_specs=pl.BlockSpec((tr, thw), lambda i, j: (i, j)),
        ),
        compiler_params=pltpu.CompilerParams(
            dimension_semantics=("parallel", "parallel"),
            vmem_limit_bytes=vmem_limit,
        ),
    )(x2, scale_rows, bias_rows)

    return out2.reshape(B, C, H, W)


if __name__ == "__main__":
    key = jax.random.PRNGKey(0)
    B, C, H, W = 2, 3, 16, 16  # small NCHW input, C=3 like ImageNet norm

    # Deterministic "parameters" (the module's mean/std constructor args).
    mean = jnp.array([0.485, 0.456, 0.406], dtype=jnp.float32)
    std = jnp.array([0.229, 0.224, 0.225], dtype=jnp.float32)

    # --- f32 image ---------------------------------------------------------
    img = jax.random.uniform(key, (B, C, H, W), dtype=jnp.float32)
    out = jax.block_until_ready(normalization_forward(img, mean, std))
    ref = (img - mean.reshape(-1, 1, 1)) / std.reshape(-1, 1, 1)
    assert out.shape == img.shape
    assert out.dtype == jnp.float32
    assert jnp.allclose(out, ref, atol=1e-5, rtol=1e-5)

    # --- bf16 image (checks dtype promotion of the output to f32) ----------
    img_bf16 = img.astype(jnp.bfloat16)
    out_bf16 = jax.block_until_ready(normalization_forward(img_bf16, mean, std))
    ref_bf16 = (img_bf16.astype(jnp.float32) - mean.reshape(-1, 1, 1)) / std.reshape(-1, 1, 1)
    assert out_bf16.dtype == jnp.float32
    assert jnp.allclose(out_bf16, ref_bf16, atol=1e-5, rtol=1e-5)

    print("KERNEL_OK")
</pallas_src>

<mosaic_0001>
module attributes {stable_mosaic.version = 11 : i64} {
  func.func @_norm_kernel(%arg0: i32, %arg1: i32, %arg2: memref<8x128xf32, #tpu.memory_space<vmem>>, %arg3: memref<8x1xf32, #tpu.memory_space<vmem>>, %arg4: memref<8x1xf32, #tpu.memory_space<vmem>>, %arg5: memref<8x128xf32, #tpu.memory_space<vmem>>) attributes {dimension_semantics = [#tpu.dimension_semantics<parallel>, #tpu.dimension_semantics<parallel>], iteration_bounds = array<i64: 1, 2>, scalar_prefetch = 0 : i64, scratch_operands = 0 : i64, tpu.core_type = #tpu.core_type<tc>, window_params = [{transform_indices = @transform_0, window_bounds = array<i64: 8, 128>}, {pipeline_mode = #tpu.pipeline_mode<synchronous>, transform_indices = @transform_1, window_bounds = array<i64: 8, 1>}, {pipeline_mode = #tpu.pipeline_mode<synchronous>, transform_indices = @transform_2, window_bounds = array<i64: 8, 1>}, {transform_indices = @transform_3, window_bounds = array<i64: 8, 128>}]} {
    %c8_i32 = arith.constant 8 : i32
    %0 = arith.muli %arg0, %c8_i32 : i32
    %1 = tpu.assume_multiple %0, 8 : i32
    %2 = arith.index_cast %1 : i32 to index
    %c0 = arith.constant 0 : index
    %3 = vector.load %arg3[%2, %c0] : memref<8x1xf32, #tpu.memory_space<vmem>>, vector<8x1xf32>
    %4 = arith.index_cast %1 : i32 to index
    %c0_0 = arith.constant 0 : index
    %5 = vector.load %arg4[%4, %c0_0] : memref<8x1xf32, #tpu.memory_space<vmem>>, vector<8x1xf32>
    %c0_1 = arith.constant 0 : index
    %c0_2 = arith.constant 0 : index
    %6 = vector.load %arg2[%c0_1, %c0_2] : memref<8x128xf32, #tpu.memory_space<vmem>>, vector<8x128xf32>
    %7 = vector.broadcast %3 : vector<8x1xf32> to vector<8x128xf32>
    %8 = arith.mulf %6, %7 : vector<8x128xf32>
    %9 = vector.broadcast %5 : vector<8x1xf32> to vector<8x128xf32>
    %10 = arith.addf %8, %9 : vector<8x128xf32>
    %c0_3 = arith.constant 0 : index
    %c0_4 = arith.constant 0 : index
    %11 = vector.load %arg5[%c0_3, %c0_4] : memref<8x128xf32, #tpu.memory_space<vmem>>, vector<8x128xf32>
    tpu.vector_store %arg5[%c0_3, %c0_4], %10 {strides = array<i32>} : memref<8x128xf32, #tpu.memory_space<vmem>>, vector<8x128xf32>,
    return
  }
  func.func @transform_0(%arg0: i32, %arg1: i32) -> (i32, i32) {
    %c0_i32 = arith.constant 0 : i32
    return %arg0, %arg1 : i32, i32
  }
  func.func @transform_1(%arg0: i32, %arg1: i32) -> (i32, i32) {
    %c0_i32 = arith.constant 0 : i32
    %c0_i32_0 = arith.constant 0 : i32
    %c0_i32_1 = arith.constant 0 : i32
    return %c0_i32, %c0_i32_0 : i32, i32
  }
  func.func @transform_2(%arg0: i32, %arg1: i32) -> (i32, i32) {
    %c0_i32 = arith.constant 0 : i32
    %c0_i32_0 = arith.constant 0 : i32
    %c0_i32_1 = arith.constant 0 : i32
    return %c0_i32, %c0_i32_0 : i32, i32
  }
  func.func @transform_3(%arg0: i32, %arg1: i32) -> (i32, i32) {
    %c0_i32 = arith.constant 0 : i32
    return %arg0, %arg1 : i32, i32
  }
}

</mosaic_0001>

<bundles_post_ra>
// kernel: tpu_custom_call.1
= control target key start
LH: loop header
LB: loop body
LE: loop exit
PB: predicated region body
PF: predicated region fallthrough
CT: control target
= control target key end

     0   :  { %8 = vsyncpa [#allocation3], 0  ;;  %s596_s0 = inlined_call_operand.vmem [shape: f32[6,256], index: 0, kind: input, shape index: {}]   ;;  %s597_s1 = inlined_call_operand.vmem [shape: f32[8,1], index: 1, kind: input, shape index: {}]   ;;  %s598_s2 = inlined_call_operand.vmem [shape: f32[8,1], index: 2, kind: input, shape index: {}]   ;;  %s599_s3 = inlined_call_operand.hbm [shape: f32[6,256], index: 3, kind: output, shape index: {}]  }
   0x1   :  { %10 = vsyncpa [#allocation3 + $0x1], 0  ;;  %s478_s12 = smov 0   ;;  %s480_s13 = smov 0  }
   0x2   :  { %s482_s14 = smov 0   ;;  %s484_s15 = smov 0  }
   0x3   :  { %s486_s16 = smov 0   ;;  %s488_s17 = smov 0  }
   0x4 LB: > { %s308_s18 = sadd.s32 4294967295, %s454_s17   ;;  %s309_s19 = sadd.s32 4294967294, %s454_s17   ;;  %s454_s17 = sphi %s488_s17, %s16_s17   ;;  %s450_s16 = sphi %s486_s16, %s606_s16   ;;  %s446_s15 = sphi %s484_s15, %s605_s15   ;;  %s442_s14 = sphi %s482_s14, %s604_s14   ;;  %s438_s13 = sphi %s480_s13, %s603_s13   ;;  %s434_s12 = sphi %s478_s12, %s602_s12  }
   0x5   : > { %s25_s20 = sadd.s32 1, %s450_s16  ;;  %s107_s21 = sadd.s32 1, %s442_s14 }
   0x6   : > { %p26_p0 = scmp.ge.s32.totalorder %s25_s20, 2  ;;  %p117_p1 = scmp.ne.s32.totalorder %s442_s14, %s438_s13 }
   0x7   : > { %p118_p2 = scmp.eq.s32.totalorder %s308_s18, 1  ;;  %p123_p3 = scmp.ne.s32.totalorder %s438_s13, %s434_s12 }
   0x8   : > { %s608_s20 = smov (%p26_p0, %s25_s20), 0  ;;  %p124_p5 = scmp.eq.s32.totalorder %s309_s19, 1 }
   0x9   : > { %p518_p4 = por %p118_p2, %p117_p1  ;;  %s103_s23 = ssub.s32 %s450_s16, %s608_s20 }
   0xa   : > { %p312_p6 = scmp.ge.s32.totalorder %s454_s17, 1  ;;  %p105_p7 = scmp.eq.s32.totalorder %s103_s23, 0 }
   0xb   : > { %p525_p8 = por %p124_p5, %p123_p3  ;;  %p159_p9 = scmp.lt.s32.totalorder %s454_s17, 3 }
   0xc   : > { %s531_s25 = scalar_select %p105_p7, %s442_s14, %s107_s21  }
   0xd   : > { %p160_p10 = pnand %p312_p6, %p159_p9 }
   0xe   : > { %v196_v0 = vld [vmem:[%s597_s1] sm:$0xff] (!%p160_p10)  ;;  %v456_v1 = vmov (!%p160_p10), 0   ;;  %p188_p11 = scmp.lt.s32.totalorder (!%p160_p10), %s446_s15, 1  ;;  %s183_s4 = sand.u32 (!%p160_p10), 1, %s438_s13  }
   0xf   : > { %163 = sbr.rel (%p160_p10) target bundleno = 164 (0xa4), region = 32  ;;  %375 = vset.pattern.permute.xlu0 (!%p160_p10), %v456_v1  ;;  %v198_v2 = vld [vmem:[%s598_s2] sm:$0xff] (!%p160_p10)  ;;  %s313_s6 = sshll.u32 (!%p160_p10), %s183_s4, 3 }
  0x10   : > { %202 = vperm.xlu0 (!%p160_p10), %375, %v196_v0   ;;  %s316_s10 = sshll.u32 (!%p160_p10), %s446_s15, 7  ;;  %s185_s11 = scalar_lea.vmem (!%p160_p10), [#allocation2], %s313_s6 }
  0x11   : > { %s229_s18 = sshll.u32 (!%p160_p10), %s185_s11, 4  ;;  %s549_s23 = scalar_lea.hbm (!%p160_p10), %s599_s3, %s316_s10  ;;  %s551_s18 = int_to_ptr.vmem [resolvable:$true] %s229_s18 }
  0x12   : > { %s214_s26 = scalar_lea.sflag (!%p160_p10), [#allocation3], %s183_s4  ;;  %s376_s27 = scalar_lea.vmem (!%p160_p10), %s551_s18, 128 }
  0x13   : > { %p377_p12 = scmp.ne.s32.totalorder (!%p160_p10), %s551_s18, %s376_s27 }
  0x14   : > { %208 = vperm.xlu0 (!%p160_p10), %375, %v198_v2  }
  0x15   : > { %p378_p13 = pnand (!%p160_p10), %p377_p12, %p518_p4 }
  0x16   : > { %s189_s30 = scalar_select %p188_p11, %s446_s15, 1 }
  0x17   : > { %p379_p0 = pneg %p378_p13  ;;  %s457_s15 = smov [#allocation2]  }
  0x18   : > { %s314_s5 = sshll.u32 %s189_s30, 3  ;;  %s380_s28 = sshll.u32 %s457_s15, 4  ;;  %s381_s28 = int_to_ptr.vmem [resolvable:$false] %s380_s28 }
  0x19   : > { %s193_s9 = scalar_lea.vmem %s596_s0, %s314_s5  ;;  %s382_s29 = scalar_lea.vmem %s381_s28, 256 }
  0x1a   : > { %v199_v4 = vld [vmem:[%s193_s9] sm:$0xff]  ;;  %p383_p1 = scmp.lt.s32.totalorder %s551_s18, %s381_s28  ;;  %p384_p2 = scmp.lt.s32.totalorder %s382_s29, %s376_s27 }
  0x1c   : > { %p385_p3 = por %p384_p2, %p383_p1 }
  0x1e   : > { %p386_p5 = pnand %p385_p3, %p379_p0 }
  0x8f   : > { %v203_v3 = vpop.permute.xlu0 %202 }
  0x90   : > { %v205_v5 = vmul.f32 %v203_v3, %v199_v4 }
  0x93   : > { %v209_v6 = vpop.permute.xlu0 %208 }
  0x94   : > { %v211_v7 = vadd.f32 %v209_v6, %v205_v5 }
  0x96   : > { %212 = vst [vmem:[%s185_s11] sm:$0xff] %v211_v7 }
  0x97   : > { %389 = shalt.err (!%p386_p5)
}
  0x98   : > { %s390_s30 = scalar_lea.hbm %s549_s23, 128  ;;  %s394_s6 = scalar_lea.hbm %s599_s3, 256 }
  0x99   : > { %p391_p6 = scmp.ne.s32.totalorder %s549_s23, %s390_s30  ;;  %p395_p10 = scmp.lt.u32.totalorder %s549_s23, %s599_s3 }
  0x9a   : > { %p396_p11 = scmp.lt.u32.totalorder %s394_s6, %s390_s30  ;;  %p398_p13 = scmp.lt.u32.totalorder %s390_s30, %s549_s23 }
  0x9b   : > { %p392_p7 = pnand %p391_p6, %p518_p4 }
  0x9c   : > { %p397_p12 = por %p396_p11, %p395_p10 }
  0x9d   : > { %p393_p9 = pneg %p392_p7 }
  0x9e   : > { %p399_p0 = por %p398_p13, %p397_p12 }
  0xa0   : > { %p400_p1 = pnand %p399_p0, %p393_p9 }
  0xa2   : > { %403 = shalt.err (!%p400_p1)
}
  0xa3   : > { %319 = dma.vmem_to_hbm [thread:$0]  (%p518_p4), %s551_s18, 128, %s549_s23, %s214_s26  }
  0xa4 PF: > { %p325_p2 = scmp.ge.s32.totalorder %s454_s17, 2  ;;  %s241_s9 = sand.u32 1, %s434_s12  }
  0xa5   : > { %s242_s10 = scalar_lea.sflag [#allocation3], %s241_s9 }
  0xa6   : > { %p322_p3 = pnand %p325_p2, %p525_p8 }
  0xa8   : > { %429 = dma.done.wait (!%p322_p3), %s242_s10, 128  }
  0xa9   : > { %431 = vsyncadd (!%p322_p3), %s242_s10, 4294967168  ;;  %s16_s17 = sadd.s32 1, %s454_s17   ;;  %s602_s12 = smov %s438_s13 }
  0xaa   : > { %p13_p5 = scmp.ge.s32.totalorder %s16_s17, 4   ;;  %s603_s13 = smov %s442_s14 }
  0xab   : > { %s604_s14 = smov %s531_s25  ;;  %s605_s15 = smov %s450_s16 }
  0xac   : > { %s606_s16 = smov %s608_s20  ;;  %15 = sbr.rel (!%p13_p5) target bundleno = 4 (0x4), region = 69 }
  0xb3   :  { %247 = vsyncpa [#allocation3], 1 }
  0xb4   :  { %249 = vsyncpa [#allocation3 + $0x1], 1 }

</bundles_post_ra>
